<compile_context>
chip_gen: v7x
topology: tpu7x:2x2x1
jax: 0.10.0
libtpu: 0.0.40
codegen_flags: <defaults>
</compile_context>

<pallas_src>
import math

import jax
import jax.numpy as jnp
from jax.experimental import pallas as pl
from jax.experimental.pallas import tpu as pltpu


# ---------------------------------------------------------------------------
# Explicit-copy Pallas kernel (identity copy of one VMEM tile).
# ---------------------------------------------------------------------------
def _copy_kernel(x_ref, o_ref):
    o_ref[...] = x_ref[...]


def _default_block_bytes() -> int:
    """Per-generation block-size cap for the copy kernel."""
    try:
        kind = jax.devices()[0].device_kind.lower()
    except Exception:
        kind = ""
    if ("v6" in kind) or ("v7" in kind):
        return 4 << 20      # 4 MiB blocks: 4 live buffers = 16 MiB, fits v7x/v6e
    return 2 << 20          # conservative cap for v5e (16 MiB scoped VMEM) & older


def _round_down(x: int, m: int) -> int:
    return max(m, (x // m) * m)


def _choose_tiles(R: int, C: int, dtype, max_block_bytes: int):
    """Pick a (tr, tc) block for a (R, C) array.

    Blocks are either full-extent along a dim (exempt from the (8,128) rule)
    or aligned multiples of (sub, 128) clamped to the byte cap; the grid uses
    cdiv so partial tail blocks are masked by Pallas — no unbounded blocks.
    """
    itemsize = jnp.dtype(dtype).itemsize
    sub = 8 * max(1, 4 // itemsize)                 # 8 f32 / 16 bf16 / 32 int8
    cap_elems = max(sub * 128, max_block_bytes // itemsize)

    # Lane (last) dim: full extent if it fits alongside >= sub rows,
    # otherwise a capped multiple of 128 (lane-dense, unmasked stores on all
    # but the tail block).
    if C * sub <= cap_elems:
        tc = C
    else:
        tc = _round_down(cap_elems // sub, 128)

    # Sublane (second-last) dim: full extent if it fits, else a capped
    # multiple of `sub`.
    row_budget = max(1, cap_elems // tc)
    if R <= row_budget:
        tr = R
    else:
        tr = _round_down(row_budget, sub)
    return tr, tc


def flatten_pallas_copy(x: jax.Array, *, max_block_bytes=None) -> jax.Array:
    """Materializing flatten: identity copy through a Pallas kernel.

    Equivalent to `x.view(x.size(0), -1)` but produces a fresh buffer.
    """
    n = x.shape[0]
    f = int(math.prod(x.shape[1:]))
    L = n * f
    if max_block_bytes is None:
        max_block_bytes = _default_block_bytes()
    itemsize = jnp.dtype(x.dtype).itemsize

    # Prefer a flat lane-dense slab view: every block is then one contiguous
    # HBM range (a run of consecutive 128-element rows of the flat buffer).
    if L % 128 == 0:
        R, C = L // 128, 128
    else:
        R, C = n, f
    x2 = jnp.reshape(x, (R, C))                      # metadata-only view

    tr, tc = _choose_tiles(R, C, x.dtype, max_block_bytes)
    grid = (pl.cdiv(R, tr), pl.cdiv(C, tc))          # cdiv -> masked tail blocks
    padded_bytes = grid[0] * tr * grid[1] * tc * itemsize

    out2 = pl.pallas_call(
        _copy_kernel,
        out_shape=jax.ShapeDtypeStruct((R, C), x.dtype),
        grid=grid,
        in_specs=[pl.BlockSpec((tr, tc), lambda i, j: (i, j))],
        out_specs=pl.BlockSpec((tr, tc), lambda i, j: (i, j)),
        compiler_params=pltpu.CompilerParams(
            dimension_semantics=("parallel", "parallel")),
        cost_estimate=pl.CostEstimate(
            flops=0, transcendentals=0, bytes_accessed=2 * padded_bytes),
    )(x2)
    return jnp.reshape(out2, (n, f))


# ---------------------------------------------------------------------------
# Public wrapper: equivalent of `x.view(x.size(0), -1)`.
# ---------------------------------------------------------------------------
def flatten_pallas(x: jax.Array, *, materialize: bool = False) -> jax.Array:
    """Flatten all dims after the batch dim.

    Default path is a pure `jnp.reshape` — a row-major metadata-only collapse
    that exactly matches torch's `.view(N, -1)` on contiguous tensors and is
    guaranteed zero-copy on every TPU generation (per perf review, the no-op
    pallas_call wrapper was dropped).  Set `materialize=True` to force an
    explicit HBM-roofline copy through the Pallas kernel.
    """
    n = x.shape[0]
    f = int(math.prod(x.shape[1:]))
    if not materialize:
        return jnp.reshape(x, (n, f))
    return flatten_pallas_copy(x)


if __name__ == "__main__":
    key = jax.random.PRNGKey(0)

    # 1) NCHW input matching the module: batch=2, channels=4, spatial=16x16.
    x = jax.random.normal(key, (2, 4, 16, 16), dtype=jnp.float32)
    ref = jnp.reshape(x, (x.shape[0], -1))

    out = jax.block_until_ready(flatten_pallas(x))              # metadata path
    assert out.shape == (2, 4 * 16 * 16) and out.dtype == x.dtype
    assert bool(jnp.array_equal(out, ref)), "reshape flatten mismatch"

    out_copy = jax.block_until_ready(flatten_pallas(x, materialize=True))
    assert out_copy.shape == ref.shape and out_copy.dtype == x.dtype
    assert bool(jnp.array_equal(out_copy, ref)), "pallas copy flatten mismatch"

    # 2) bf16 input whose flattened dim (3*10*10 = 300) is not a multiple of
    #    128 and whose total size (1200) is not either -> (N, F) fallback view
    #    with full-extent (clamped) blocks.
    x_b = jax.random.normal(jax.random.PRNGKey(0), (4, 3, 10, 10),
                            dtype=jnp.bfloat16)
    ref_b = jnp.reshape(x_b, (4, -1))
    out_b = jax.block_until_ready(flatten_pallas(x_b))
    assert out_b.shape == (4, 300) and out_b.dtype == x_b.dtype
    assert bool(jnp.array_equal(out_b, ref_b)), "reshape (bf16) mismatch"
    out_b_copy = jax.block_until_ready(flatten_pallas(x_b, materialize=True))
    assert bool(jnp.array_equal(out_b_copy, ref_b)), "pallas copy (bf16) mismatch"

    # 3) Exercise the multi-block flat-slab path with a masked row tail:
    #    total = 2*3*40*40 = 9600 = 75*128, tiny 16 KiB cap -> grid (3, 1),
    #    last block partially masked.
    x_c = jax.random.normal(jax.random.PRNGKey(0), (2, 3, 40, 40),
                            dtype=jnp.float32)
    ref_c = jnp.reshape(x_c, (2, -1))
    out_c = jax.block_until_ready(
        flatten_pallas_copy(x_c, max_block_bytes=16 << 10))
    assert bool(jnp.array_equal(out_c, ref_c)), "masked-row-tail copy mismatch"

    # 4) Exercise the (N, F) path with lane tiling + masked lane tail:
    #    F = 900 (not a multiple of 128), total 1800 not a multiple of 128,
    #    tiny 4 KiB cap -> blocks (2, 128), grid (1, 8), last column block masked.
    x_d = jax.random.normal(jax.random.PRNGKey(0), (2, 3, 10, 30),
                            dtype=jnp.float32)
    ref_d = jnp.reshape(x_d, (2, -1))
    out_d = jax.block_until_ready(
        flatten_pallas_copy(x_d, max_block_bytes=4 << 10))
    assert bool(jnp.array_equal(out_d, ref_d)), "masked-lane-tail copy mismatch"

    print("KERNEL_OK")
</pallas_src>

<mosaic_0001>
module attributes {stable_mosaic.version = 11 : i64} {
  func.func @_copy_kernel(%arg0: i32, %arg1: i32, %arg2: memref<16x128xf32, #tpu.memory_space<vmem>>, %arg3: memref<16x128xf32, #tpu.memory_space<vmem>>) attributes {dimension_semantics = [#tpu.dimension_semantics<parallel>, #tpu.dimension_semantics<parallel>], iteration_bounds = array<i64: 1, 1>, scalar_prefetch = 0 : i64, scratch_operands = 0 : i64, tpu.core_type = #tpu.core_type<tc>, window_params = [{transform_indices = @transform_0, window_bounds = array<i64: 16, 128>}, {transform_indices = @transform_1, window_bounds = array<i64: 16, 128>}]} {
    %c0 = arith.constant 0 : index
    %c0_0 = arith.constant 0 : index
    %0 = vector.load %arg2[%c0, %c0_0] : memref<16x128xf32, #tpu.memory_space<vmem>>, vector<16x128xf32>
    %c0_1 = arith.constant 0 : index
    %c0_2 = arith.constant 0 : index
    %1 = vector.load %arg3[%c0_1, %c0_2] : memref<16x128xf32, #tpu.memory_space<vmem>>, vector<16x128xf32>
    tpu.vector_store %arg3[%c0_1, %c0_2], %0 {strides = array<i32>} : memref<16x128xf32, #tpu.memory_space<vmem>>, vector<16x128xf32>,
    return
  }
  func.func @transform_0(%arg0: i32, %arg1: i32) -> (i32, i32) {
    %c0_i32 = arith.constant 0 : i32
    return %arg0, %arg1 : i32, i32
  }
  func.func @transform_1(%arg0: i32, %arg1: i32) -> (i32, i32) {
    %c0_i32 = arith.constant 0 : i32
    return %arg0, %arg1 : i32, i32
  }
}

</mosaic_0001>

<bundles_post_ra>
// kernel: tpu_custom_call.1
= control target key start
LH: loop header
LB: loop body
LE: loop exit
PB: predicated region body
PF: predicated region fallthrough
CT: control target
= control target key end

     0   :  { %6 = vsyncpa [#allocation3], 0  ;;  %s134_s0 = inlined_call_operand.hbm [shape: f32[16,128], index: 0, kind: input, shape index: {}]   ;;  %s135_s1 = inlined_call_operand.hbm [shape: f32[16,128], index: 1, kind: output, shape index: {}]  }
   0x1   :  { %7 = vsyncpa [#allocation4], 0  ;;  %s96_s6 = smov [#allocation2]   ;;  %s48_s10 = scalar_lea.hbm %s134_s0, 256 }
   0x2   :  { %s13_s7 = sshll.u32 %s96_s6, 4  ;;  %p49_p0 = scmp.ne.s32.totalorder %s134_s0, %s48_s10  ;;  %s14_s7 = int_to_ptr.vmem [resolvable:$true] %s13_s7 }
   0x3   :  { %p52_p1 = scmp.lt.u32.totalorder %s48_s10, %s134_s0 }
   0x5   :  { %p54_p2 = pnand %p52_p1, %p49_p0 }
   0x7   :  { %57 = shalt.err (!%p54_p2)
}
   0x8   :  { %s58_s15 = scalar_lea.vmem %s14_s7, 256  ;;  %p63_p4 = scmp.lt.s32.totalorder %s14_s7, %s14_s7 }
   0x9   :  { %p59_p3 = scmp.ne.s32.totalorder %s14_s7, %s58_s15  ;;  %p64_p5 = scmp.lt.s32.totalorder %s58_s15, %s58_s15 }
   0xb   :  { %p65_p6 = por %p64_p5, %p63_p4 }
   0xd   :  { %p66_p7 = pnand %p65_p6, %p59_p3 }
   0xf   :  { %69 = shalt.err (!%p66_p7)
}
  0x10   :  { %s97_s16 = smov 128   ;;  %s98_s17 = smov 8  }
  0x11   :  { %19 = dma.hbm_to_vmem [thread:$0]  %s134_s0, 256, %s14_s7, [#allocation3], %s97_s16, %s97_s16, %s98_s17  }
  0x12   :  { %92 = dma.done.wait [#allocation3], 256  }
  0x13   :  { %93 = vsyncadd [#allocation3], 4294967040  ;;  %s99_s20 = smov [#allocation5]   ;;  %v23_v0 = vld [vmem:[#allocation2] sm:$0xff]  ;;  %v24_v1 = vld [vmem:[#allocation2 + $0x8] sm:$0xff] }
  0x14   :  { %s32_s21 = sshll.u32 %s99_s20, 4  ;;  %25 = vst [vmem:[#allocation5] sm:$0xff] %v23_v0  ;;  %26 = vst [vmem:[#allocation5 + $0x8] sm:$0xff] %v24_v1  ;;  %s33_s21 = int_to_ptr.vmem [resolvable:$true] %s32_s21 }
  0x15   :  { %s70_s22 = scalar_lea.vmem %s33_s21, 256  ;;  %p75_p9 = scmp.lt.s32.totalorder %s33_s21, %s33_s21 }
  0x16   :  { %p71_p8 = scmp.ne.s32.totalorder %s33_s21, %s70_s22  ;;  %p76_p10 = scmp.lt.s32.totalorder %s70_s22, %s70_s22 }
  0x18   :  { %p77_p11 = por %p76_p10, %p75_p9 }
  0x1a   :  { %p78_p12 = pnand %p77_p11, %p71_p8 }
  0x1c   :  { %81 = shalt.err (!%p78_p12)
}
  0x1d   :  { %s82_s0 = scalar_lea.hbm %s135_s1, 256 }
  0x1e   :  { %p83_p13 = scmp.ne.s32.totalorder %s135_s1, %s82_s0  ;;  %p86_p0 = scmp.lt.u32.totalorder %s82_s0, %s135_s1 }
  0x20   :  { %p88_p1 = pnand %p86_p0, %p83_p13 }
  0x22   :  { %91 = shalt.err (!%p88_p1)
}
  0x23   :  { %38 = dma.vmem_to_hbm [thread:$0]  %s33_s21, 256, %s135_s1, [#allocation4], %s97_s16, %s97_s16, %s98_s17  }
  0x24   :  { %94 = dma.done.wait [#allocation4], 256  }
  0x25   :  { %95 = vsyncadd [#allocation4], 4294967040 }
  0x26   :  { %42 = vsyncpa [#allocation3], 1 }
  0x27   :  { %43 = vsyncpa [#allocation4], 1 }

</bundles_post_ra>
